<compile_context>
chip_gen: v7x
topology: tpu7x:2x2x1
jax: 0.10.0
libtpu: 0.0.40
codegen_flags: <defaults>
</compile_context>

<pallas_src>
import jax
import jax.numpy as jnp
from jax import lax
from jax.experimental import pallas as pl
from jax.experimental.pallas import tpu as pltpu


def _round_up(n, m):
    return ((n + m - 1) // m) * m


def _cdiv(a, b):
    return -(-a // b)


def mlp_kernel(x_ref, w1_ref, b1_ref, w2_ref, b2_ref, w3_ref, b3_ref, o_ref):
    # x_ref: (TILE_B, IN) f32, natural row-major layout (no wrapper transpose pass).
    x = x_ref[...].astype(jnp.bfloat16)                                   # (TB, IN) bf16
    # Layer 1: contract both operands' minor (feature) axes -> (128, TB).
    # Batch lands on the lane axis and stays there for the rest of the kernel.
    h1 = lax.dot_general(
        w1_ref[...], x,
        dimension_numbers=(((1,), (1,)), ((), ())),
        preferred_element_type=jnp.float32)                               # (128, TB) f32
    # bias + ReLU in f32 (v5e-safe), cast fused into the same expression so the
    # f32 and bf16 copies of h1 are never both live.
    h1 = jnp.maximum(h1 + b1_ref[...], 0.0).astype(jnp.bfloat16)          # (128, TB) bf16
    h2 = jnp.dot(w2_ref[...], h1, preferred_element_type=jnp.float32)     # (64, TB) f32
    h2 = jnp.maximum(h2 + b2_ref[...], 0.0)
    # Final 64->1 layer: VPU multiply + cross-sublane (XLU) reduction — keeps the
    # MXU free and yields a lane-dense (1, TB) result directly.
    out = jnp.sum(h2 * w3_ref[...], axis=0, keepdims=True) + b3_ref[0, 0] # (1, TB) f32
    o_ref[...] = out.astype(o_ref.dtype)


def _vmem_limit_bytes(tile_b):
    # Rough per-batch-column live bytes:
    #   x double-buffer (f32, 32 lanes padded to 128): 2 * 512
    #   h1 f32 transient 512, h1 bf16 256, h2 f32 256, x^T bf16 operand 128
    per_col = 2 * 512 + 512 + 256 + 256 + 128
    est = tile_b * per_col + (1 << 20)
    # >=32 MiB (lifts v5e above its 16 MiB scoped default), <=56 MiB (fits v7x's
    # 64 MiB/TC physical VMEM with headroom; v5e/v6e have 128 MiB physical).
    return int(min(56 * 1024 * 1024, max(32 * 1024 * 1024, (est * 3) // 2)))


def price_predictor_forward(x, params, *, tile_b=8192, core_parallel=False):
    """x: (batch, in_features) f32.  params in PyTorch layout: W (out,in), b (out,)."""
    w1, b1, w2, b2, w3, b3 = params
    batch, in_features = x.shape
    hidden1 = w1.shape[0]
    hidden2 = w2.shape[0]

    # Padding policy: pad batch only to a multiple of 128 (lane width), then derive
    # the tile from the step count so awkward batches don't pad to a full tile.
    tile_cap = max(128, _round_up(int(tile_b), 128))
    padded128 = _round_up(batch, 128)
    nb = max(1, _cdiv(padded128, tile_cap))
    tile_b = _round_up(_cdiv(padded128, nb), 128)
    padded = tile_b * nb

    x_pad = x if padded == batch else jnp.pad(x, ((0, padded - batch), (0, 0)))
    x_pad = x_pad.astype(jnp.float32)                     # streamed operand, natural layout

    w1_b = w1.astype(jnp.bfloat16)                        # (128, IN)
    w2_b = w2.astype(jnp.bfloat16)                        # (64, 128)
    b1_c = b1.reshape(hidden1, 1).astype(jnp.float32)     # (128, 1)
    b2_c = b2.reshape(hidden2, 1).astype(jnp.float32)     # (64, 1)
    w3_c = w3.reshape(hidden2, 1).astype(jnp.float32)     # (64, 1) — VPU operand
    b3_s = b3.reshape(1, 1).astype(jnp.float32)           # scalar in SMEM

    flops = 2 * padded * (in_features * hidden1 + hidden1 * hidden2 + hidden2)
    bytes_accessed = (
        x_pad.size * 4 + w1_b.size * 2 + w2_b.size * 2
        + (b1_c.size + b2_c.size + w3_c.size + b3_s.size) * 4
        + padded * 4
    )
    cost = pl.CostEstimate(flops=flops, transcendentals=0,
                           bytes_accessed=bytes_accessed)

    def resident(shape):
        # Fully VMEM-resident operand: same block every grid step (no re-DMA).
        return pl.BlockSpec(shape, lambda i: (0,) * len(shape))

    # v7x: pltpu.CORE_PARALLEL guarantees the batch grid is split across both
    # TensorCores; plain PARALLEL stays the portable default for v5e/v6e.
    batch_sem = pltpu.CORE_PARALLEL if core_parallel else pltpu.PARALLEL

    out = pl.pallas_call(
        mlp_kernel,
        out_shape=jax.ShapeDtypeStruct((1, padded), jnp.float32),
        grid=(nb,),
        in_specs=[
            pl.BlockSpec((tile_b, in_features), lambda i: (i, 0)),  # x: batch-tiled rows
            resident(w1_b.shape),
            resident(b1_c.shape),
            resident(w2_b.shape),
            resident(b2_c.shape),
            resident(w3_c.shape),
            pl.BlockSpec(memory_space=pltpu.MemorySpace.SMEM),      # b3 scalar
        ],
        out_specs=pl.BlockSpec((1, tile_b), lambda i: (0, i)),      # lane-dense output row
        compiler_params=pltpu.CompilerParams(
            dimension_semantics=(batch_sem,),
            vmem_limit_bytes=_vmem_limit_bytes(tile_b),
        ),
        cost_estimate=cost,
    )(x_pad, w1_b, b1_c, w2_b, b2_c, w3_c, b3_s)

    # (1, padded) -> (batch, 1), dropping the padded rows.
    return out.reshape(padded, 1)[:batch]


def init_params(key, input_size):
    # PyTorch nn.Linear default init: U(-1/sqrt(fan_in), 1/sqrt(fan_in)),
    # weights stored PyTorch-style as (out_features, in_features).
    def linear(key, fan_in, fan_out):
        kw, kb = jax.random.split(key)
        bound = 1.0 / jnp.sqrt(float(fan_in))
        w = jax.random.uniform(kw, (fan_out, fan_in), jnp.float32, -bound, bound)
        b = jax.random.uniform(kb, (fan_out,), jnp.float32, -bound, bound)
        return w, b

    k1, k2, k3 = jax.random.split(key, 3)
    w1, b1 = linear(k1, input_size, 128)
    w2, b2 = linear(k2, 128, 64)
    w3, b3 = linear(k3, 64, 1)
    return (w1, b1, w2, b2, w3, b3)


def reference_forward(x, params):
    w1, b1, w2, b2, w3, b3 = params
    h1 = jnp.maximum(x @ w1.T + b1, 0.0)
    h2 = jnp.maximum(h1 @ w2.T + b2, 0.0)
    return h2 @ w3.T + b3


if __name__ == "__main__":
    key = jax.random.PRNGKey(0)
    k_params, k_x1, k_x2 = jax.random.split(key, 3)

    input_size = 32
    params = init_params(k_params, input_size)

    # Test 1: small batch (single tile + remainder padding).
    x_small = jax.random.normal(k_x1, (8, input_size), jnp.float32)
    out_small = jax.block_until_ready(price_predictor_forward(x_small, params))
    ref_small = reference_forward(x_small, params)
    assert out_small.shape == (8, 1)
    # bf16 MXU inputs (f32 accumulation) vs pure-f32 reference -> modest tolerance.
    assert jnp.allclose(out_small, ref_small, atol=2e-2, rtol=2e-2)

    # Test 2: multi-tile path with a batch that is not a multiple of the tile
    # (exercises the grid, remainder padding, and output reshape ordering).
    x_multi = jax.random.normal(k_x2, (300, input_size), jnp.float32)
    out_multi = jax.block_until_ready(
        price_predictor_forward(x_multi, params, tile_b=128))
    ref_multi = reference_forward(x_multi, params)
    assert out_multi.shape == (300, 1)
    assert jnp.allclose(out_multi, ref_multi, atol=2e-2, rtol=2e-2)

    print("KERNEL_OK")
</pallas_src>

<mosaic_0001>
module attributes {stable_mosaic.version = 11 : i64} {
  func.func @mlp_kernel(%arg0: i32, %arg1: memref<128x32xf32, #tpu.memory_space<vmem>>, %arg2: memref<128x32xbf16, #tpu.memory_space<vmem>>, %arg3: memref<128x1xf32, #tpu.memory_space<vmem>>, %arg4: memref<64x128xbf16, #tpu.memory_space<vmem>>, %arg5: memref<64x1xf32, #tpu.memory_space<vmem>>, %arg6: memref<64x1xf32, #tpu.memory_space<vmem>>, %arg7: memref<1x1xf32, #tpu.memory_space<smem>>, %arg8: memref<1x128xf32, #tpu.memory_space<vmem>>) attributes {dimension_semantics = [#tpu.dimension_semantics<parallel>], iteration_bounds = array<i64: 1>, scalar_prefetch = 0 : i64, scratch_operands = 0 : i64, tpu.core_type = #tpu.core_type<tc>, window_params = [{transform_indices = @transform_0, window_bounds = array<i64: 128, 32>}, {pipeline_mode = #tpu.pipeline_mode<synchronous>, transform_indices = @transform_1, window_bounds = array<i64: 128, 32>}, {pipeline_mode = #tpu.pipeline_mode<synchronous>, transform_indices = @transform_2, window_bounds = array<i64: 128, 1>}, {pipeline_mode = #tpu.pipeline_mode<synchronous>, transform_indices = @transform_3, window_bounds = array<i64: 64, 128>}, {pipeline_mode = #tpu.pipeline_mode<synchronous>, transform_indices = @transform_4, window_bounds = array<i64: 64, 1>}, {pipeline_mode = #tpu.pipeline_mode<synchronous>, transform_indices = @transform_5, window_bounds = array<i64: 64, 1>}, {transform_indices = @transform_6, window_bounds = array<i64: 1, 1>}, {transform_indices = @transform_7, window_bounds = array<i64: 1, 128>}]} {
    %c0 = arith.constant 0 : index
    %c0_0 = arith.constant 0 : index
    %0 = vector.load %arg1[%c0, %c0_0] : memref<128x32xf32, #tpu.memory_space<vmem>>, vector<128x32xf32>
    %1 = arith.truncf %0 : vector<128x32xf32> to vector<128x32xbf16>
    %c0_1 = arith.constant 0 : index
    %c0_2 = arith.constant 0 : index
    %2 = vector.load %arg2[%c0_1, %c0_2] : memref<128x32xbf16, #tpu.memory_space<vmem>>, vector<128x32xbf16>
    %cst = arith.constant dense<0.000000e+00> : vector<128x128xf32>
    %3 = tpu.matmul %2, %1, %cst {dimension_numbers = #tpu.dot_dimension_numbers<[1], [1], [0], [0], [0, 0, 1, 0], [], []>} : vector<128x32xbf16>, vector<128x32xbf16>, vector<128x128xf32> -> vector<128x128xf32>
    %c0_3 = arith.constant 0 : index
    %c0_4 = arith.constant 0 : index
    %4 = vector.load %arg3[%c0_3, %c0_4] : memref<128x1xf32, #tpu.memory_space<vmem>>, vector<128x1xf32>
    %5 = vector.broadcast %4 : vector<128x1xf32> to vector<128x128xf32>
    %6 = arith.addf %3, %5 : vector<128x128xf32>
    %cst_5 = arith.constant 0.000000e+00 : f32
    %7 = vector.broadcast %cst_5 : f32 to vector<128x128xf32>
    %8 = arith.maximumf %6, %7 : vector<128x128xf32>
    %9 = arith.truncf %8 : vector<128x128xf32> to vector<128x128xbf16>
    %c0_6 = arith.constant 0 : index
    %c0_7 = arith.constant 0 : index
    %10 = vector.load %arg4[%c0_6, %c0_7] : memref<64x128xbf16, #tpu.memory_space<vmem>>, vector<64x128xbf16>
    %cst_8 = arith.constant dense<0.000000e+00> : vector<64x128xf32>
    %11 = tpu.matmul %10, %9, %cst_8 {dimension_numbers = #tpu.dot_dimension_numbers<[1], [0], [0], [1], [0, 0, 1, 1], [], []>} : vector<64x128xbf16>, vector<128x128xbf16>, vector<64x128xf32> -> vector<64x128xf32>
    %c0_9 = arith.constant 0 : index
    %c0_10 = arith.constant 0 : index
    %12 = vector.load %arg5[%c0_9, %c0_10] : memref<64x1xf32, #tpu.memory_space<vmem>>, vector<64x1xf32>
    %13 = vector.broadcast %12 : vector<64x1xf32> to vector<64x128xf32>
    %14 = arith.addf %11, %13 : vector<64x128xf32>
    %cst_11 = arith.constant 0.000000e+00 : f32
    %15 = vector.broadcast %cst_11 : f32 to vector<64x128xf32>
    %16 = arith.maximumf %14, %15 : vector<64x128xf32>
    %c0_12 = arith.constant 0 : index
    %c0_13 = arith.constant 0 : index
    %17 = vector.load %arg6[%c0_12, %c0_13] : memref<64x1xf32, #tpu.memory_space<vmem>>, vector<64x1xf32>
    %18 = vector.broadcast %17 : vector<64x1xf32> to vector<64x128xf32>
    %19 = arith.mulf %16, %18 : vector<64x128xf32>
    %cst_14 = arith.constant dense<0.000000e+00> : vector<128xf32>
    %20 = vector.multi_reduction <add>, %19, %cst_14 [0] : vector<64x128xf32> to vector<128xf32>
    %21 = vector.shape_cast %20 : vector<128xf32> to vector<1x128xf32>
    %c0_15 = arith.constant 0 : index
    %c0_16 = arith.constant 0 : index
    %22 = memref.load %arg7[%c0_15, %c0_16] : memref<1x1xf32, #tpu.memory_space<smem>>
    %23 = vector.broadcast %22 : f32 to vector<1x128xf32>
    %24 = arith.addf %21, %23 : vector<1x128xf32>
    %c0_17 = arith.constant 0 : index
    %c0_18 = arith.constant 0 : index
    %25 = vector.load %arg8[%c0_17, %c0_18] : memref<1x128xf32, #tpu.memory_space<vmem>>, vector<1x128xf32>
    tpu.vector_store %arg8[%c0_17, %c0_18], %24 {strides = array<i32>} : memref<1x128xf32, #tpu.memory_space<vmem>>, vector<1x128xf32>,
    return
  }
  func.func @transform_0(%arg0: i32) -> (i32, i32) {
    %c0_i32 = arith.constant 0 : i32
    %c0_i32_0 = arith.constant 0 : i32
    return %arg0, %c0_i32 : i32, i32
  }
  func.func @transform_1(%arg0: i32) -> (i32, i32) {
    %c0_i32 = arith.constant 0 : i32
    %c0_i32_0 = arith.constant 0 : i32
    %c0_i32_1 = arith.constant 0 : i32
    return %c0_i32, %c0_i32_0 : i32, i32
  }
  func.func @transform_2(%arg0: i32) -> (i32, i32) {
    %c0_i32 = arith.constant 0 : i32
    %c0_i32_0 = arith.constant 0 : i32
    %c0_i32_1 = arith.constant 0 : i32
    return %c0_i32, %c0_i32_0 : i32, i32
  }
  func.func @transform_3(%arg0: i32) -> (i32, i32) {
    %c0_i32 = arith.constant 0 : i32
    %c0_i32_0 = arith.constant 0 : i32
    %c0_i32_1 = arith.constant 0 : i32
    return %c0_i32, %c0_i32_0 : i32, i32
  }
  func.func @transform_4(%arg0: i32) -> (i32, i32) {
    %c0_i32 = arith.constant 0 : i32
    %c0_i32_0 = arith.constant 0 : i32
    %c0_i32_1 = arith.constant 0 : i32
    return %c0_i32, %c0_i32_0 : i32, i32
  }
  func.func @transform_5(%arg0: i32) -> (i32, i32) {
    %c0_i32 = arith.constant 0 : i32
    %c0_i32_0 = arith.constant 0 : i32
    %c0_i32_1 = arith.constant 0 : i32
    return %c0_i32, %c0_i32_0 : i32, i32
  }
  func.func @transform_6(%arg0: i32) -> (i32, i32) {
    %c0_i32 = arith.constant 0 : i32
    %c0_i32_0 = arith.constant 0 : i32
    %c0_i32_1 = arith.constant 0 : i32
    return %c0_i32, %c0_i32_0 : i32, i32
  }
  func.func @transform_7(%arg0: i32) -> (i32, i32) {
    %c0_i32 = arith.constant 0 : i32
    %c0_i32_0 = arith.constant 0 : i32
    return %c0_i32, %arg0 : i32, i32
  }
}

</mosaic_0001>

<bundles_post_ra>
// kernel: tpu_custom_call.1
= control target key start
LH: loop header
LB: loop body
LE: loop exit
PB: predicated region body
PF: predicated region fallthrough
CT: control target
= control target key end

     0   :  { %vm205_vm0 = vcmask 261120   ;;  %v767_v5 = vmov 0   ;;  %s1028_s0 = inlined_call_operand.vmem [shape: f32[128,32], index: 0, kind: input, shape index: {}]   ;;  %s1029_s1 = inlined_call_operand.vmem [shape: bf16[128,32], index: 1, kind: input, shape index: {}]   ;;  %s1030_s2 = inlined_call_operand.vmem [shape: f32[128,1], index: 2, kind: input, shape index: {}]   ;;  %s1031_s3 = inlined_call_operand.vmem [shape: bf16[64,128], index: 3, kind: input, shape index: {}]   ;;  %s1032_s4 = inlined_call_operand.vmem [shape: f32[64,1], index: 4, kind: input, shape index: {}]   ;;  %s1033_s5 = inlined_call_operand.vmem [shape: f32[64,1], index: 5, kind: input, shape index: {}]   ;;  %s1034_s6 = inlined_call_operand.<no memory space> [shape: f32[1,1], index: 6, kind: input, shape index: {}]   ;;  %s1035_s7 = inlined_call_operand.hbm [shape: f32[1,128], index: 7, kind: output, shape index: {}]  }
   0x1   :  { %v29_v0 = vld [vmem:[%s1028_s0] sm:$0xff]  ;;  %v30_v1 = vld [vmem:[%s1028_s0 + $0x8] sm:$0xff]  ;;  %v31_v2 = vld [vmem:[%s1028_s0 + $0x10] sm:$0xff]  ;;  %729 = vset.pattern.permute.xlu0 %v767_v5  ;;  %730 = vset.pattern.permute.xlu1 %v767_v5 }
   0x2   :  { %v45_v3 = vpack.c.bf16 %v30_v1, %v29_v0  ;;  %v32_v4 = vld [vmem:[%s1028_s0 + $0x18] sm:$0xff]  ;;  %v33_v8 = vld [vmem:[%s1028_s0 + $0x20] sm:$0xff]  ;;  %v34_v9 = vld [vmem:[%s1028_s0 + $0x28] sm:$0xff] }
   0x3   :  { %v46_v6 = vpack.c.bf16 %v32_v4, %v31_v2  ;;  %v731_v10 = vld [vmem:[%s1029_s1] sm:$0xff]   ;;  %v47_v12 = vpack.c.bf16 %v34_v9, %v33_v8  ;;  %v71_v14 = vld [vmem:[%s1030_s2 + $0x10] sm:$0xff]  ;;  %v36_v16 = vld [vmem:[%s1028_s0 + $0x38] sm:$0xff] }
   0x4   :  { %719 = vmatprep.subr.msk.bf16.mxu0 %vm205_vm0, %v45_v3  ;;  %v231_v7 = vsel %vm205_vm0, %v45_v3, 0  ;;  %679 = vmatprep.mubr.msk.bf16.mxu0 %vm205_vm0, %v731_v10  ;;  %v69_v13 = vld [vmem:[%s1030_s2] sm:$0xff]  ;;  %v35_v15 = vld [vmem:[%s1028_s0 + $0x30] sm:$0xff]  ;;  %v70_v17 = vld [vmem:[%s1030_s2 + $0x8] sm:$0xff] }
   0x5   :  { %664 = vmatpush3.bf16.xpose.msra.mxu0 %v231_v7  ;;  %v234_v11 = vsel %vm205_vm0, %v46_v6, 0  ;;  %87 = vperm.xlu0 %729, %v69_v13   ;;  %v72_v18 = vld [vmem:[%s1030_s2 + $0x18] sm:$0xff]  ;;  %v237_v19 = vsel %vm205_vm0, %v47_v12, 0  ;;  %v48_v20 = vpack.c.bf16 %v36_v16, %v35_v15  ;;  %v73_v21 = vld [vmem:[%s1030_s2 + $0x20] sm:$0xff]  ;;  %v74_v22 = vld [vmem:[%s1030_s2 + $0x28] sm:$0xff] }
   0x6   :  { %720 = vmatprep.subr.msk.bf16.mxu0 %vm205_vm0, %v46_v6  ;;  %97 = vperm.xlu1 %730, %v71_v14   ;;  %v75_v23 = vld [vmem:[%s1030_s2 + $0x30] sm:$0xff]  ;;  %v37_v24 = vld [vmem:[%s1028_s0 + $0x40] sm:$0xff]  ;;  %v38_v25 = vld [vmem:[%s1028_s0 + $0x48] sm:$0xff] }
   0x7   :  { %v240_v26 = vsel %vm205_vm0, %v48_v20, 0  ;;  %v76_v27 = vld [vmem:[%s1030_s2 + $0x38] sm:$0xff]  ;;  %v77_v28 = vld [vmem:[%s1030_s2 + $0x40] sm:$0xff]  ;;  %v49_v29 = vpack.c.bf16 %v38_v25, %v37_v24 }
   0x9   :  { %92 = vperm.xlu0 %729, %v70_v17  }
   0xa   :  { %102 = vperm.xlu1 %730, %v72_v18  }
   0xd   :  { %666 = vmatpush3.bf16.xpose.msra.mxu0 %v234_v11  ;;  %107 = vperm.xlu0 %729, %v73_v21  }
   0xe   :  { %721 = vmatprep.subr.msk.bf16.mxu0 %vm205_vm0, %v47_v12  ;;  %112 = vperm.xlu1 %730, %v74_v22  }
  0x11   :  { %117 = vperm.xlu0 %729, %v75_v23  }
  0x12   :  { %122 = vperm.xlu1 %730, %v76_v27  }
  0x15   :  { %668 = vmatpush3.bf16.xpose.msra.mxu0 %v237_v19 }
  0x16   :  { %722 = vmatprep.subr.msk.bf16.mxu0 %vm205_vm0, %v48_v20 }
  0x17   :  { %13 = vsyncpa [#allocation4], 0  ;;  %v78_v30 = vld [vmem:[%s1030_s2 + $0x48] sm:$0xff]  ;;  %127 = vperm.xlu0 %729, %v77_v28   ;;  %v79_v31 = vld [vmem:[%s1030_s2 + $0x50] sm:$0xff]  ;;  %v243_v35 = vsel %vm205_vm0, %v49_v29, 0 }
  0x18   :  { %v39_v32 = vld [vmem:[%s1028_s0 + $0x50] sm:$0xff]  ;;  %v40_v33 = vld [vmem:[%s1028_s0 + $0x58] sm:$0xff]  ;;  %132 = vperm.xlu1 %730, %v78_v30   ;;  %v81_v37 = vld [vmem:[%s1030_s2 + $0x60] sm:$0xff] }
  0x19   :  { %v80_v34 = vld [vmem:[%s1030_s2 + $0x58] sm:$0xff]  ;;  %v50_v36 = vpack.c.bf16 %v40_v33, %v39_v32  ;;  %v82_v38 = vld [vmem:[%s1030_s2 + $0x68] sm:$0xff]  ;;  %v83_v39 = vld [vmem:[%s1030_s2 + $0x70] sm:$0xff] }
  0x1a   :  { %v41_v40 = vld [vmem:[%s1028_s0 + $0x60] sm:$0xff]  ;;  %v42_v41 = vld [vmem:[%s1028_s0 + $0x68] sm:$0xff]  ;;  %v84_v42 = vld [vmem:[%s1030_s2 + $0x78] sm:$0xff]  ;;  %s768_s2 = smov [#allocation3]  }
  0x1b   :  { %137 = vperm.xlu0 %729, %v79_v31   ;;  %v246_v43 = vsel %vm205_vm0, %v50_v36, 0  ;;  %v51_v44 = vpack.c.bf16 %v42_v41, %v41_v40  ;;  %v383_v45 = vld [vmem:[%s1032_s4] sm:$0xff]  ;;  %v384_v46 = vld [vmem:[%s1032_s4 + $0x8] sm:$0xff]  ;;  %v385_v47 = vld [vmem:[%s1032_s4 + $0x10] sm:$0xff]  ;;  %s607_s23 = sshll.u32 %s768_s2, 4  ;;  %s608_s23 = int_to_ptr.vmem [resolvable:$true] %s607_s23 }
  0x1c   :  { %142 = vperm.xlu1 %730, %v80_v34   ;;  %v43_v48 = vld [vmem:[%s1028_s0 + $0x70] sm:$0xff]  ;;  %v44_v49 = vld [vmem:[%s1028_s0 + $0x78] sm:$0xff]  ;;  %v528_v53 = vld [vmem:[%s1033_s5] sm:$0xff]  ;;  %s743_s24 = scalar_lea.vmem %s608_s23, 16  ;;  %s747_s25 = scalar_lea.vmem %s608_s23, 32 }
  0x1d   :  { %670 = vmatpush3.bf16.xpose.msra.mxu0 %v240_v26  ;;  %v386_v50 = vld [vmem:[%s1032_s4 + $0x18] sm:$0xff]  ;;  %v249_v51 = vsel %vm205_vm0, %v51_v44, 0  ;;  %v52_v52 = vpack.c.bf16 %v44_v49, %v43_v48  ;;  %v529_v54 = vld [vmem:[%s1033_s5 + $0x8] sm:$0xff]  ;;  %v387_v55 = vld [vmem:[%s1032_s4 + $0x20] sm:$0xff]  ;;  %p744_p0 = scmp.ne.s32.totalorder %s608_s23, %s743_s24  ;;  %p748_p1 = scmp.lt.s32.totalorder %s608_s23, %s608_s23 }
  0x1e   :  { %723 = vmatprep.subr.msk.bf16.mxu0 %vm205_vm0, %v49_v29  ;;  %v530_v56 = vld [vmem:[%s1033_s5 + $0x10] sm:$0xff]  ;;  %v388_v58 = vld [vmem:[%s1032_s4 + $0x28] sm:$0xff]  ;;  %v531_v59 = vld [vmem:[%s1033_s5 + $0x18] sm:$0xff]  ;;  %p749_p2 = scmp.lt.s32.totalorder %s747_s25, %s743_s24 }
  0x1f   :  { %147 = vperm.xlu0 %729, %v81_v37   ;;  %v252_v57 = vsel %vm205_vm0, %v52_v52, 0  ;;  %v389_v60 = vld [vmem:[%s1032_s4 + $0x30] sm:$0xff]  ;;  %v732_v61 = vld [vmem:[%s1029_s1 + $0x8] sm:$0xff]   ;;  %v532_v62 = vld [vmem:[%s1033_s5 + $0x20] sm:$0xff] }
  0x20   :  { %152 = vperm.xlu1 %730, %v82_v38   ;;  %v733_v63 = vld [vmem:[%s1029_s1 + $0x10] sm:$0xff]   ;;  %v390_v0 = vld [vmem:[%s1032_s4 + $0x38] sm:$0xff]  ;;  %v533_v1 = vld [vmem:[%s1033_s5 + $0x28] sm:$0xff]  ;;  %p750_p3 = por %p749_p2, %p748_p1 }
  0x21   :  { %v534_v2 = vld [vmem:[%s1033_s5 + $0x30] sm:$0xff]  ;;  %v734_v3 = vld [vmem:[%s1029_s1 + $0x18] sm:$0xff]   ;;  %v735_v5 = vld [vmem:[%s1029_s1 + $0x20] sm:$0xff]  }
  0x22   :  { %v535_v4 = vld [vmem:[%s1033_s5 + $0x38] sm:$0xff]  ;;  %v736_v6 = vld [vmem:[%s1029_s1 + $0x28] sm:$0xff]   ;;  %v737_v7 = vld [vmem:[%s1029_s1 + $0x30] sm:$0xff]   ;;  %p751_p4 = pnand %p750_p3, %p744_p0 }
  0x23   :  { %157 = vperm.xlu0 %729, %v83_v39   ;;  %v738_v8 = vld [vmem:[%s1029_s1 + $0x38] sm:$0xff]   ;;  %v739_v9 = vld [vmem:[%s1031_s3] sm:$0xff]  }
  0x24   :  { %162 = vperm.xlu1 %730, %v84_v42   ;;  %711 = vmatprep.mubr.bf16.mxu1 %v739_v9 }
  0x25   :  { %672 = vmatpush3.bf16.xpose.msra.mxu0 %v243_v35 }
  0x26   :  { %724 = vmatprep.subr.msk.bf16.mxu0 %vm205_vm0, %v50_v36 }
  0x27   :  { %393 = vperm.xlu0 %729, %v383_v45  }
  0x28   :  { %398 = vperm.xlu1 %730, %v384_v46  }
  0x2b   :  { %403 = vperm.xlu0 %729, %v385_v47  }
  0x2c   :  { %408 = vperm.xlu1 %730, %v386_v50  }
  0x2d   :  { %674 = vmatpush3.bf16.xpose.msra.mxu0 %v246_v43 }
  0x2e   :  { %725 = vmatprep.subr.msk.bf16.mxu0 %vm205_vm0, %v51_v44 }
  0x2f   :  { %538 = vperm.xlu0 %729, %v528_v53  }
  0x30   :  { %543 = vperm.xlu1 %730, %v529_v54  }
  0x33   :  { %413 = vperm.xlu0 %729, %v387_v55  }
  0x34   :  { %548 = vperm.xlu1 %730, %v530_v56  }
  0x35   :  { %676 = vmatpush3.bf16.xpose.msra.mxu0 %v249_v51 }
  0x36   :  { %726 = vmatprep.subr.msk.bf16.mxu0 %vm205_vm0, %v52_v52 }
  0x37   :  { %418 = vperm.xlu0 %729, %v388_v58  }
  0x38   :  { %553 = vperm.xlu1 %730, %v531_v59  }
  0x3b   :  { %423 = vperm.xlu0 %729, %v389_v60  }
  0x3c   :  { %558 = vperm.xlu1 %730, %v532_v62  }
  0x3d   :  { %678 = vmatpush3.bf16.xpose.msra.mxu0 %v252_v57 }
  0x3f   :  { %428 = vperm.xlu0 %729, %v390_v0  }
  0x40   :  { %563 = vperm.xlu1 %730, %v533_v1  }
  0x43   :  { %568 = vperm.xlu0 %729, %v534_v2  }
  0x44   :  { %680 = vmatmul.mubr.msk.bf16.vlgmr.msra.gmra.mrb[0].mxu0 %vm205_vm0, %v732_v61  ;;  %573 = vperm.xlu1 %730, %v535_v4  }
  0x45   :  { %683 = vmatprep.mubr.msk.bf16.mxu0 %vm205_vm0, %v733_v63 }
  0x4c   :  { %684 = vmatmul.mubr.msk.bf16.gmra.mrb[4].mxu0 %vm205_vm0, %v734_v3 }
  0x4d   :  { %687 = vmatprep.mubr.msk.bf16.mxu0 %vm205_vm0, %v735_v5 }
  0x54   :  { %688 = vmatmul.mubr.msk.bf16.gmra.mrb[8].mxu0 %vm205_vm0, %v736_v6 }
  0x55   :  { %691 = vmatprep.mubr.msk.bf16.mxu0 %vm205_vm0, %v737_v7 }
  0x5c   :  { %692 = vmatmul.mubr.msk.bf16.gmra.mrb[12].mxu0 %vm205_vm0, %v738_v8 }
  0x84   :  { %v88_v10 = vpop.permute.xlu0 %87 }
  0x85   :  { %v98_v11 = vpop.permute.xlu1 %97 }
  0x88   :  { %v93_v12 = vpop.permute.xlu0 %92 }
  0x89   :  { %v103_v13 = vpop.permute.xlu1 %102 }
  0x8c   :  { %v108_v14 = vpop.permute.xlu0 %107 }
  0x8d   :  { %v113_v15 = vpop.permute.xlu1 %112 }
  0x90   :  { %v118_v16 = vpop.permute.xlu0 %117 }
  0x91   :  { %v123_v20 = vpop.permute.xlu1 %122 }
  0x96   :  { %v128_v28 = vpop.permute.xlu0 %127 }
  0x97   :  { %v133_v32 = vpop.permute.xlu1 %132 }
  0x9a   :  { %v138_v41 = vpop.permute.xlu0 %137 }
  0x9b   :  { %v143_v45 = vpop.permute.xlu1 %142 }
  0x9e   :  { %v148_v53 = vpop.permute.xlu0 %147 }
  0x9f   :  { %v153_v58 = vpop.permute.xlu1 %152 }
  0xa2   :  { %v158_v1 = vpop.permute.xlu0 %157 }
  0xa3   :  { %v163_v6 = vpop.permute.xlu1 %162 }
 0x117   :  { %v681_v17 = vpop.f32.mrb[0].mxu0 }
 0x118   :  { %v297_v18 = vadd.f32 %v681_v17, %v98_v11  ;;  %v288_v19 = vpop.f32.mrb[1].mxu0 }
 0x119   :  { %v289_v21 = vadd.f32 %v288_v19, %v88_v10  ;;  %v682_v22 = vpop.f32.mrb[2].mxu0  ;;  %v741_v19 = vld [vmem:[%s1031_s3 + $0x10] sm:$0xff]  }
 0x11a   :  { %v300_v23 = vadd.f32 %v682_v22, %v103_v13  ;;  %v291_v24 = vpop.f32.mrb[3].mxu0  ;;  %v353_v26 = vmax.f32 %v297_v18, 0.0  ;;  %v740_v18 = vld [vmem:[%s1031_s3 + $0x8] sm:$0xff]   ;;  %v399_v22 = vpop.permute.xlu1 %398 }
 0x11b   :  { %v292_v25 = vadd.f32 %v291_v24, %v93_v12  ;;  %v351_v29 = vmax.f32 %v289_v21, 0.0  ;;  %v394_v21 = vpop.permute.xlu0 %393 }
 0x11c   :  { %v354_v27 = vmax.f32 %v300_v23, 0.0 }
 0x11d   :  { %v352_v30 = vmax.f32 %v292_v25, 0.0 }
 0x11e   :  { %v368_v31 = vpack.c.bf16 %v354_v27, %v353_v26  ;;  %v409_v24 = vpop.permute.xlu1 %408 }
 0x11f   :  { %v685_v33 = vpop.f32.mrb[4].mxu0  ;;  %v367_v34 = vpack.c.bf16 %v352_v30, %v351_v29  ;;  %v404_v23 = vpop.permute.xlu0 %403 }
 0x120   :  { %v313_v35 = vadd.f32 %v685_v33, %v118_v16  ;;  %v304_v36 = vpop.f32.mrb[5].mxu0 }
 0x121   :  { %v305_v37 = vadd.f32 %v304_v36, %v108_v14  ;;  %v686_v38 = vpop.f32.mrb[6].mxu0  ;;  %695 = vmatprep.subr.bf16.mxu1 %v367_v34 }
 0x122   :  { %v316_v39 = vadd.f32 %v686_v38, %v123_v20  ;;  %v307_v40 = vpop.f32.mrb[7].mxu0  ;;  %696 = vmatpush3.bf16.msra.mxu1 %v367_v34  ;;  %v357_v43 = vmax.f32 %v313_v35, 0.0  ;;  %v742_v20 = vld [vmem:[%s1031_s3 + $0x18] sm:$0xff]   ;;  %v544_v26 = vpop.permute.xlu1 %543 }
 0x123   :  { %v308_v42 = vadd.f32 %v307_v40, %v113_v15  ;;  %697 = vmatprep.subr.bf16.mxu1 %v368_v31  ;;  %v355_v46 = vmax.f32 %v305_v37, 0.0  ;;  %v539_v25 = vpop.permute.xlu0 %538 }
 0x124   :  { %v358_v44 = vmax.f32 %v316_v39, 0.0 }
 0x125   :  { %v356_v47 = vmax.f32 %v308_v42, 0.0 }
 0x126   :  { %v370_v48 = vpack.c.bf16 %v358_v44, %v357_v43  ;;  %698 = vmatpush3.bf16.msra.mxu1 %v368_v31 }
 0x127   :  { %v369_v49 = vpack.c.bf16 %v356_v47, %v355_v46  ;;  %v689_v50 = vpop.f32.mrb[8].mxu0  ;;  %v414_v27 = vpop.permute.xlu0 %413 }
 0x128   :  { %v329_v51 = vadd.f32 %v689_v50, %v138_v41  ;;  %v320_v52 = vpop.f32.mrb[9].mxu0 }
 0x129   :  { %v321_v54 = vadd.f32 %v320_v52, %v128_v28  ;;  %v690_v55 = vpop.f32.mrb[10].mxu0  ;;  %699 = vmatprep.subr.bf16.mxu1 %v369_v49  ;;  %v549_v28 = vpop.permute.xlu1 %548 }
 0x12a   :  { %v332_v56 = vadd.f32 %v690_v55, %v143_v45  ;;  %v323_v57 = vpop.f32.mrb[11].mxu0  ;;  %700 = vmatpush3.bf16.msra.mxu1 %v369_v49  ;;  %v361_v60 = vmax.f32 %v329_v51, 0.0 }
 0x12b   :  { %v324_v59 = vadd.f32 %v323_v57, %v133_v32  ;;  %701 = vmatprep.subr.bf16.mxu1 %v370_v48  ;;  %v359_v62 = vmax.f32 %v321_v54, 0.0  ;;  %v419_v29 = vpop.permute.xlu0 %418 }
 0x12c   :  { %v362_v61 = vmax.f32 %v332_v56, 0.0 }
 0x12d   :  { %v360_v63 = vmax.f32 %v324_v59, 0.0  ;;  %v554_v31 = vpop.permute.xlu1 %553 }
 0x12e   :  { %v372_v0 = vpack.c.bf16 %v362_v61, %v361_v60  ;;  %702 = vmatpush3.bf16.msra.mxu1 %v370_v48 }
 0x12f   :  { %v371_v2 = vpack.c.bf16 %v360_v63, %v359_v62  ;;  %v693_v3 = vpop.f32.mrb[12].mxu0  ;;  %v424_v40 = vpop.permute.xlu0 %423 }
 0x130   :  { %v345_v4 = vadd.f32 %v693_v3, %v158_v1  ;;  %v336_v5 = vpop.f32.mrb[13].mxu0 }
 0x131   :  { %v337_v7 = vadd.f32 %v336_v5, %v148_v53  ;;  %v694_v8 = vpop.f32.mrb[14].mxu0  ;;  %703 = vmatprep.subr.bf16.mxu1 %v371_v2  ;;  %v559_v43 = vpop.permute.xlu1 %558 }
 0x132   :  { %v348_v9 = vadd.f32 %v694_v8, %v163_v6  ;;  %v339_v10 = vpop.f32.mrb[15].mxu0  ;;  %704 = vmatpush3.bf16.msra.mxu1 %v371_v2  ;;  %v365_v12 = vmax.f32 %v345_v4, 0.0 }
 0x133   :  { %v340_v11 = vadd.f32 %v339_v10, %v153_v58  ;;  %705 = vmatprep.subr.bf16.mxu1 %v372_v0  ;;  %v363_v14 = vmax.f32 %v337_v7, 0.0  ;;  %v429_v54 = vpop.permute.xlu0 %428 }
 0x134   :  { %v366_v13 = vmax.f32 %v348_v9, 0.0 }
 0x135   :  { %v364_v15 = vmax.f32 %v340_v11, 0.0  ;;  %v564_v61 = vpop.permute.xlu1 %563 }
 0x136   :  { %v374_v16 = vpack.c.bf16 %v366_v13, %v365_v12  ;;  %706 = vmatpush3.bf16.msra.mxu1 %v372_v0 }
 0x137   :  { %v373_v17 = vpack.c.bf16 %v364_v15, %v363_v14  ;;  %v569_v5 = vpop.permute.xlu0 %568 }
 0x139   :  { %707 = vmatprep.subr.bf16.mxu1 %v373_v17  ;;  %v574_v8 = vpop.permute.xlu1 %573 }
 0x13a   :  { %708 = vmatpush3.bf16.msra.mxu1 %v373_v17  ;;  %v598_v17 = vstv %s1034_s6 }
 0x13b   :  { %709 = vmatprep.subr.bf16.mxu1 %v374_v16 }
 0x13e   :  { %710 = vmatpush3.bf16.msra.mxu1 %v374_v16 }
 0x141   :  { %712 = vmatmul.mubr.bf16.vlgmr.msra.gmra.mrb[0].mxu1 %v740_v18 }
 0x142   :  { %715 = vmatprep.mubr.bf16.mxu1 %v741_v19 }
 0x149   :  { %716 = vmatmul.mubr.bf16.gmra.mrb[4].mxu1 %v742_v20 }
 0x214   :  { %v713_v30 = vpop.f32.mrb[0].mxu1 }
 0x215   :  { %v489_v32 = vpop.f32.mrb[1].mxu1  ;;  %v498_v33 = vadd.f32 %v713_v30, %v404_v23 }
 0x216   :  { %v490_v34 = vadd.f32 %v489_v32, %v394_v21  ;;  %v714_v35 = vpop.f32.mrb[2].mxu1 }
 0x217   :  { %v501_v36 = vadd.f32 %v714_v35, %v409_v24  ;;  %v492_v37 = vpop.f32.mrb[3].mxu1  ;;  %v522_v41 = vmax.f32 %v498_v33, 0.0 }
 0x218   :  { %v520_v38 = vmax.f32 %v490_v34, 0.0  ;;  %v493_v39 = vadd.f32 %v492_v37, %v399_v22 }
 0x219   :  { %v523_v44 = vmax.f32 %v501_v36, 0.0  ;;  %v578_v49 = vmul.f32 %v549_v28, %v522_v41 }
 0x21a   :  { %v521_v42 = vmax.f32 %v493_v39, 0.0  ;;  %v576_v45 = vmul.f32 %v539_v25, %v520_v38 }
 0x21b   :  { %v579_v55 = vmul.f32 %v554_v31, %v523_v44 }
 0x21c   :  { %v577_v46 = vmul.f32 %v544_v26, %v521_v42  ;;  %v717_v47 = vpop.f32.mrb[4].mxu1 }
 0x21d   :  { %v505_v48 = vpop.f32.mrb[5].mxu1  ;;  %v514_v51 = vadd.f32 %v717_v47, %v424_v40 }
 0x21e   :  { %v584_v50 = vadd.f32 %v577_v46, %v576_v45  ;;  %v506_v52 = vadd.f32 %v505_v48, %v414_v27  ;;  %v718_v53 = vpop.f32.mrb[6].mxu1 }
 0x21f   :  { %v508_v56 = vpop.f32.mrb[7].mxu1  ;;  %v517_v59 = vadd.f32 %v718_v53, %v429_v54  ;;  %v526_v62 = vmax.f32 %v514_v51, 0.0 }
 0x220   :  { %v585_v57 = vadd.f32 %v584_v50, %v578_v49  ;;  %v524_v58 = vmax.f32 %v506_v52, 0.0  ;;  %v509_v60 = vadd.f32 %v508_v56, %v419_v29 }
 0x221   :  { %v527_v3 = vmax.f32 %v517_v59, 0.0  ;;  %v582_v6 = vmul.f32 %v569_v5, %v526_v62 }
 0x222   :  { %v580_v63 = vmul.f32 %v559_v43, %v524_v58  ;;  %v586_v0 = vadd.f32 %v585_v57, %v579_v55  ;;  %v525_v1 = vmax.f32 %v509_v60, 0.0 }
 0x223   :  { %v583_v9 = vmul.f32 %v574_v8, %v527_v3 }
 0x224   :  { %v587_v2 = vadd.f32 %v586_v0, %v580_v63  ;;  %v581_v4 = vmul.f32 %v564_v61, %v525_v1 }
 0x226   :  { %v588_v7 = vadd.f32 %v587_v2, %v581_v4 }
 0x228   :  { %v589_v10 = vadd.f32 %v588_v7, %v582_v6 }
 0x22a   :  { %v590_v11 = vadd.f32 %v589_v10, %v583_v9 }
 0x22c   :  { %v591_v12 = vrot.slane %v590_v11, 4 }
 0x22e   :  { %v592_v13 = vadd.f32 %v591_v12, %v590_v11 }
 0x230   :  { %v593_v14 = vrot.slane %v592_v13, 2 }
 0x232   :  { %v594_v15 = vadd.f32 %v593_v14, %v592_v13 }
 0x234   :  { %v595_v16 = vrot.slane %v594_v15, 1 }
 0x236   :  { %v596_v18 = vadd.f32 %v595_v16, %v594_v15 }
 0x238   :  { %v599_v19 = vadd.f32 %v598_v17, %v596_v18 }
 0x23a   :  { %600 = vst [vmem:[#allocation3] sm:$0x1] %v599_v19 }
 0x23b   :  { %754 = shalt.err (!%p751_p4)
}
 0x23c   :  { %s755_s28 = scalar_lea.hbm %s1035_s7, 16 }
 0x23d   :  { %p756_p5 = scmp.ne.s32.totalorder %s1035_s7, %s755_s28  ;;  %p759_p6 = scmp.lt.u32.totalorder %s755_s28, %s1035_s7 }
 0x23f   :  { %p761_p7 = pnand %p759_p6, %p756_p5 }
 0x241   :  { %764 = shalt.err (!%p761_p7)
}
 0x242   :  { %610 = dma.vmem_to_hbm [thread:$0]  %s608_s23, 16, %s1035_s7, [#allocation4]  }
 0x243   :  { %765 = dma.done.wait [#allocation4], 16  }
 0x244   :  { %766 = vsyncadd [#allocation4], 4294967280 }
 0x245   :  { %614 = vsyncpa [#allocation4], 1 }

</bundles_post_ra>
